<compile_context>
chip_gen: v6e
topology: v6e:2x2x1
jax: 0.10.0
libtpu: 0.0.40
codegen_flags: <defaults>
</compile_context>

<pallas_src>
import math

import jax
import jax.numpy as jnp
import numpy as np
from jax.experimental import pallas as pl
from jax.experimental.pallas import tpu as pltpu  # noqa: F401  (kept for TPU backend import)

# ----- model config (small, synthetic) -----
B = 2          # batch
S = 8          # sequence length
D = 32         # d_model
H = 4          # num_attention_heads
HD = D // H    # attention_head_size
DFF = 64       # dim_feedforward
EPS = 1e-12


def _layer_norm(x, gamma, beta, eps):
    u = jnp.mean(x, axis=-1, keepdims=True)
    xc = x - u
    var = jnp.mean(xc * xc, axis=-1, keepdims=True)
    # rsqrt -> EUP slot (nearly free) instead of a VPU divide by sqrt
    return gamma * (xc * jax.lax.rsqrt(var + eps)) + beta


def bert_layer_kernel(x_ref, bias_ref, hmask_ref,
                      wq_ref, bq_ref, wk_ref, bk_ref, wv_ref, bv_ref,
                      wo_ref, bo_ref,
                      ln1g_ref, ln1b_ref,
                      w1_ref, b1_ref, w2_ref, b2_ref,
                      ln2g_ref, ln2b_ref,
                      o_ref):
    # x:     (B*S, D)        flattened tokens
    # bias:  (B*S, B*S)      additive attention bias: (1-mask)*-1e4 within a batch,
    #                        -1e9 across batches (blocks cross-batch attention exactly)
    # hmask: (H, 1, D)       1.0 on lanes belonging to head h, 0.0 elsewhere
    # wq/wk/wv/wo: (D, D)    original (un-split) projection weights
    x = x_ref[...]                                   # (BS, D)
    n_heads = hmask_ref.shape[0]
    d_model = x.shape[1]
    d_head = d_model // n_heads
    bs = x.shape[0]

    # --- QKV projections: three plain 2-D MXU matmuls ---
    q = jnp.dot(x, wq_ref[...], preferred_element_type=jnp.float32) + bq_ref[...]
    k = jnp.dot(x, wk_ref[...], preferred_element_type=jnp.float32) + bk_ref[...]
    v = jnp.dot(x, wv_ref[...], preferred_element_type=jnp.float32) + bv_ref[...]

    # --- per-head attention via lane-masked K / V (no reshapes / transposes) ---
    hmask = hmask_ref[...]                           # (H, 1, D)
    kh = k[None, :, :] * hmask                       # (H, BS, D), zero outside head lanes
    vh = v[None, :, :] * hmask                       # (H, BS, D)

    q = q * (1.0 / math.sqrt(d_head))                # fold attention scale into Q once
    qb = jnp.broadcast_to(q, (n_heads, bs, d_model))  # (H, BS, D)

    scores = jnp.einsum('nqd,nkd->nqk', qb, kh,
                        preferred_element_type=jnp.float32)   # (H, BS, BS)
    scores = scores + bias_ref[...]                  # mask bias applied once (broadcast over H)

    m = jnp.max(scores, axis=-1, keepdims=True)
    p = jnp.exp(scores - m)
    p = p / jnp.sum(p, axis=-1, keepdims=True)       # softmax over keys (exact)

    ctx = jnp.einsum('nqk,nkd->nqd', p, vh,
                     preferred_element_type=jnp.float32)      # (H, BS, D)
    # vh[h] is zero outside head h's lanes, so summing over heads reproduces the
    # concat-over-heads context layout with plain vector adds (no XLU work).
    ctx = jnp.sum(ctx, axis=0)                       # (BS, D)

    attn = jnp.dot(ctx, wo_ref[...], preferred_element_type=jnp.float32) + bo_ref[...]

    # --- Add & LayerNorm 1 ---  (dropout1 is identity at inference)
    h1 = _layer_norm(x + attn, ln1g_ref[...], ln1b_ref[...], EPS)

    # --- FeedForward: Linear -> gelu(erf) -> Linear ---
    ff = jnp.dot(h1, w1_ref[...], preferred_element_type=jnp.float32) + b1_ref[...]
    ff = ff * 0.5 * (1.0 + jax.lax.erf(ff * (1.0 / math.sqrt(2.0))))
    ff = jnp.dot(ff, w2_ref[...], preferred_element_type=jnp.float32) + b2_ref[...]

    # --- Add & LayerNorm 2 ---  (dropout2 is identity at inference)
    out = _layer_norm(h1 + ff, ln2g_ref[...], ln2b_ref[...], EPS)
    o_ref[...] = out.astype(o_ref.dtype)


def bert_layer(hidden_states, attention_mask, params, num_heads=H):
    """hidden_states: (B, S, D) f32; attention_mask: (B, S, S) f32 (1 = keep)."""
    Bn, Sn, Dn = hidden_states.shape
    hd = Dn // num_heads
    BSn = Bn * Sn

    # Flatten (B, S, D) -> (B*S, D) so the whole layer runs in one grid step.
    x2 = hidden_states.reshape(BSn, Dn)

    # Additive attention bias over the fused token axis:
    #   within-batch: (1 - mask) * -1e4   (matches the PyTorch module)
    #   cross-batch : -1e9                (exp underflows to exactly 0 -> no mixing)
    within = (1.0 - attention_mask.astype(jnp.float32)) * (-10000.0)     # (B, S, S)
    bias_full = jnp.full((BSn, BSn), -1e9, jnp.float32)
    for b in range(Bn):
        bias_full = bias_full.at[b * Sn:(b + 1) * Sn, b * Sn:(b + 1) * Sn].set(within[b])

    # (H, 1, D) head lane mask: 1.0 on the lanes owned by head h (wrapper-side constant).
    head_idx = jnp.arange(num_heads, dtype=jnp.int32)[:, None, None]     # (H,1,1)
    lane_idx = jnp.arange(Dn, dtype=jnp.int32)[None, None, :]            # (1,1,D)
    hmask = ((lane_idx // hd) == head_idx).astype(jnp.float32)           # (H,1,D)

    # Single invocation, no grid: every operand mapped whole into VMEM.
    # TODO(synk): for production BERT shapes (D>=768, S=512) re-introduce a tiled grid
    # (and lane-dense 128-multiple activations); at these tiny shapes one step is optimal.
    out2 = pl.pallas_call(
        bert_layer_kernel,
        out_shape=jax.ShapeDtypeStruct((BSn, Dn), hidden_states.dtype),
    )(x2, bias_full, hmask,
      params["wq"], params["bq"], params["wk"], params["bk"],
      params["wv"], params["bv"],
      params["wo"], params["bo"],
      params["ln1_g"], params["ln1_b"],
      params["w1"], params["b1"], params["w2"], params["b2"],
      params["ln2_g"], params["ln2_b"])

    return out2.reshape(Bn, Sn, Dn)


# ----- pure JAX reference (for correctness check) -----
def bert_layer_ref(x, mask, p):
    q = x @ p["wq"] + p["bq"]
    k = x @ p["wk"] + p["bk"]
    v = x @ p["wv"] + p["bv"]
    qh = q.reshape(B, S, H, HD).transpose(0, 2, 1, 3)
    kh = k.reshape(B, S, H, HD).transpose(0, 2, 1, 3)
    vh = v.reshape(B, S, H, HD).transpose(0, 2, 1, 3)
    scores = jnp.einsum("bhqd,bhkd->bhqk", qh, kh) / math.sqrt(HD)
    scores = scores + ((1.0 - mask)[:, None, :, :] * -10000.0)
    probs = jax.nn.softmax(scores, axis=-1)
    ctx = jnp.einsum("bhqk,bhkd->bhqd", probs, vh).transpose(0, 2, 1, 3).reshape(B, S, D)
    attn = ctx @ p["wo"] + p["bo"]

    def ln(x, g, b):
        u = x.mean(-1, keepdims=True)
        s = ((x - u) ** 2).mean(-1, keepdims=True)
        return g * ((x - u) / jnp.sqrt(s + EPS)) + b

    h1 = ln(x + attn, p["ln1_g"], p["ln1_b"])
    ff = h1 @ p["w1"] + p["b1"]
    ff = ff * 0.5 * (1.0 + jax.lax.erf(ff / jnp.sqrt(2.0)))
    ff = ff @ p["w2"] + p["b2"]
    return ln(h1 + ff, p["ln2_g"], p["ln2_b"])


def make_params(key):
    ks = jax.random.split(key, 8)

    def lin(k, fan_in, fan_out):
        return jax.random.normal(k, (fan_in, fan_out), jnp.float32) * 0.05

    p = {
        "wq": lin(ks[0], D, D),  "bq": jnp.full((1, D), 0.01, jnp.float32),
        "wk": lin(ks[1], D, D),  "bk": jnp.full((1, D), 0.02, jnp.float32),
        "wv": lin(ks[2], D, D),  "bv": jnp.full((1, D), 0.03, jnp.float32),
        "wo": lin(ks[3], D, D),  "bo": jnp.full((1, D), 0.04, jnp.float32),
        "ln1_g": jnp.ones((1, D), jnp.float32),
        "ln1_b": jnp.zeros((1, D), jnp.float32),
        "w1": lin(ks[4], D, DFF), "b1": jnp.full((1, DFF), 0.01, jnp.float32),
        "w2": lin(ks[5], DFF, D), "b2": jnp.full((1, D), 0.02, jnp.float32),
        "ln2_g": jnp.ones((1, D), jnp.float32),
        "ln2_b": jnp.zeros((1, D), jnp.float32),
    }
    return p


if __name__ == "__main__":
    key = jax.random.PRNGKey(0)
    k_x, k_m, k_p = jax.random.split(key, 3)

    hidden_states = jax.random.normal(k_x, (B, S, D), jnp.float32)
    # binary attention mask (1 = attend), last two key positions masked out for batch 1
    attention_mask = jnp.ones((B, S, S), jnp.float32)
    attention_mask = attention_mask.at[1, :, S - 2:].set(0.0)

    params = make_params(k_p)

    out = bert_layer(hidden_states, attention_mask, params)
    out = jax.block_until_ready(out)

    ref = bert_layer_ref(hidden_states, attention_mask, params)
    np.testing.assert_allclose(np.asarray(out), np.asarray(ref), rtol=2e-4, atol=2e-4)

    print("KERNEL_OK")
</pallas_src>

<mosaic_0001>
module attributes {stable_mosaic.version = 11 : i64} {
  func.func @bert_layer_kernel(%arg0: memref<16x32xf32, #tpu.memory_space<vmem>>, %arg1: memref<16x16xf32, #tpu.memory_space<vmem>>, %arg2: memref<4x1x32xf32, #tpu.memory_space<vmem>>, %arg3: memref<32x32xf32, #tpu.memory_space<vmem>>, %arg4: memref<1x32xf32, #tpu.memory_space<vmem>>, %arg5: memref<32x32xf32, #tpu.memory_space<vmem>>, %arg6: memref<1x32xf32, #tpu.memory_space<vmem>>, %arg7: memref<32x32xf32, #tpu.memory_space<vmem>>, %arg8: memref<1x32xf32, #tpu.memory_space<vmem>>, %arg9: memref<32x32xf32, #tpu.memory_space<vmem>>, %arg10: memref<1x32xf32, #tpu.memory_space<vmem>>, %arg11: memref<1x32xf32, #tpu.memory_space<vmem>>, %arg12: memref<1x32xf32, #tpu.memory_space<vmem>>, %arg13: memref<32x64xf32, #tpu.memory_space<vmem>>, %arg14: memref<1x64xf32, #tpu.memory_space<vmem>>, %arg15: memref<64x32xf32, #tpu.memory_space<vmem>>, %arg16: memref<1x32xf32, #tpu.memory_space<vmem>>, %arg17: memref<1x32xf32, #tpu.memory_space<vmem>>, %arg18: memref<1x32xf32, #tpu.memory_space<vmem>>, %arg19: memref<16x32xf32, #tpu.memory_space<vmem>>) attributes {dimension_semantics = [], scalar_prefetch = 0 : i64, scratch_operands = 0 : i64, tpu.core_type = #tpu.core_type<tc>} {
    %c0 = arith.constant 0 : index
    %c0_0 = arith.constant 0 : index
    %0 = vector.load %arg0[%c0, %c0_0] : memref<16x32xf32, #tpu.memory_space<vmem>>, vector<16x32xf32>
    %c0_1 = arith.constant 0 : index
    %c0_2 = arith.constant 0 : index
    %1 = vector.load %arg3[%c0_1, %c0_2] : memref<32x32xf32, #tpu.memory_space<vmem>>, vector<32x32xf32>
    %cst = arith.constant dense<0.000000e+00> : vector<16x32xf32>
    %2 = tpu.matmul %0, %1, %cst {dimension_numbers = #tpu.dot_dimension_numbers<[1], [0], [0], [1], [0, 0, 1, 1], [], []>} : vector<16x32xf32>, vector<32x32xf32>, vector<16x32xf32> -> vector<16x32xf32>
    %c0_3 = arith.constant 0 : index
    %c0_4 = arith.constant 0 : index
    %3 = vector.load %arg4[%c0_3, %c0_4] : memref<1x32xf32, #tpu.memory_space<vmem>>, vector<1x32xf32>
    %4 = vector.broadcast %3 : vector<1x32xf32> to vector<16x32xf32>
    %5 = arith.addf %2, %4 : vector<16x32xf32>
    %c0_5 = arith.constant 0 : index
    %c0_6 = arith.constant 0 : index
    %6 = vector.load %arg5[%c0_5, %c0_6] : memref<32x32xf32, #tpu.memory_space<vmem>>, vector<32x32xf32>
    %cst_7 = arith.constant dense<0.000000e+00> : vector<16x32xf32>
    %7 = tpu.matmul %0, %6, %cst_7 {dimension_numbers = #tpu.dot_dimension_numbers<[1], [0], [0], [1], [0, 0, 1, 1], [], []>} : vector<16x32xf32>, vector<32x32xf32>, vector<16x32xf32> -> vector<16x32xf32>
    %c0_8 = arith.constant 0 : index
    %c0_9 = arith.constant 0 : index
    %8 = vector.load %arg6[%c0_8, %c0_9] : memref<1x32xf32, #tpu.memory_space<vmem>>, vector<1x32xf32>
    %9 = vector.broadcast %8 : vector<1x32xf32> to vector<16x32xf32>
    %10 = arith.addf %7, %9 : vector<16x32xf32>
    %c0_10 = arith.constant 0 : index
    %c0_11 = arith.constant 0 : index
    %11 = vector.load %arg7[%c0_10, %c0_11] : memref<32x32xf32, #tpu.memory_space<vmem>>, vector<32x32xf32>
    %cst_12 = arith.constant dense<0.000000e+00> : vector<16x32xf32>
    %12 = tpu.matmul %0, %11, %cst_12 {dimension_numbers = #tpu.dot_dimension_numbers<[1], [0], [0], [1], [0, 0, 1, 1], [], []>} : vector<16x32xf32>, vector<32x32xf32>, vector<16x32xf32> -> vector<16x32xf32>
    %c0_13 = arith.constant 0 : index
    %c0_14 = arith.constant 0 : index
    %13 = vector.load %arg8[%c0_13, %c0_14] : memref<1x32xf32, #tpu.memory_space<vmem>>, vector<1x32xf32>
    %14 = vector.broadcast %13 : vector<1x32xf32> to vector<16x32xf32>
    %15 = arith.addf %12, %14 : vector<16x32xf32>
    %c0_15 = arith.constant 0 : index
    %c0_16 = arith.constant 0 : index
    %c0_17 = arith.constant 0 : index
    %16 = vector.load %arg2[%c0_15, %c0_16, %c0_17] : memref<4x1x32xf32, #tpu.memory_space<vmem>>, vector<4x1x32xf32>
    %17 = vector.shape_cast %10 : vector<16x32xf32> to vector<1x16x32xf32>
    %18 = vector.broadcast %17 : vector<1x16x32xf32> to vector<4x16x32xf32>
    %19 = vector.broadcast %16 : vector<4x1x32xf32> to vector<4x16x32xf32>
    %20 = arith.mulf %18, %19 : vector<4x16x32xf32>
    %21 = vector.shape_cast %15 : vector<16x32xf32> to vector<1x16x32xf32>
    %22 = vector.broadcast %21 : vector<1x16x32xf32> to vector<4x16x32xf32>
    %23 = vector.broadcast %16 : vector<4x1x32xf32> to vector<4x16x32xf32>
    %24 = arith.mulf %22, %23 : vector<4x16x32xf32>
    %cst_18 = arith.constant 0.353553385 : f32
    %25 = vector.broadcast %cst_18 : f32 to vector<16x32xf32>
    %26 = arith.mulf %5, %25 : vector<16x32xf32>
    %27 = vector.shape_cast %26 : vector<16x32xf32> to vector<1x16x32xf32>
    %28 = vector.broadcast %27 : vector<1x16x32xf32> to vector<4x16x32xf32>
    "tpu.trace_start"() <{level = 10 : i32, message = "nqd,nkd->nqk"}> : () -> ()
    %cst_19 = arith.constant dense<0.000000e+00> : vector<4x16x16xf32>
    %29 = tpu.matmul %28, %20, %cst_19 {dimension_numbers = #tpu.dot_dimension_numbers<[2], [2], [1], [1], [0, 0, 0, 1, 1, 1], [0], [0]>} : vector<4x16x32xf32>, vector<4x16x32xf32>, vector<4x16x16xf32> -> vector<4x16x16xf32>
    "tpu.trace_stop"() : () -> ()
    %c0_20 = arith.constant 0 : index
    %c0_21 = arith.constant 0 : index
    %30 = vector.load %arg1[%c0_20, %c0_21] : memref<16x16xf32, #tpu.memory_space<vmem>>, vector<16x16xf32>
    %31 = vector.shape_cast %30 : vector<16x16xf32> to vector<1x16x16xf32>
    %32 = vector.broadcast %31 : vector<1x16x16xf32> to vector<4x16x16xf32>
    %33 = arith.addf %29, %32 : vector<4x16x16xf32>
    %cst_22 = arith.constant dense<0xFF800000> : vector<4x16xf32>
    %34 = vector.multi_reduction <maximumf>, %33, %cst_22 [2] : vector<4x16x16xf32> to vector<4x16xf32>
    %35 = vector.shape_cast %34 : vector<4x16xf32> to vector<4x16x1xf32>
    %36 = vector.broadcast %35 : vector<4x16x1xf32> to vector<4x16x16xf32>
    %37 = arith.subf %33, %36 : vector<4x16x16xf32>
    %38 = math.exp %37 : vector<4x16x16xf32>
    %cst_23 = arith.constant dense<0.000000e+00> : vector<4x16xf32>
    %39 = vector.multi_reduction <add>, %38, %cst_23 [2] : vector<4x16x16xf32> to vector<4x16xf32>
    %40 = vector.shape_cast %39 : vector<4x16xf32> to vector<4x16x1xf32>
    %41 = vector.broadcast %40 : vector<4x16x1xf32> to vector<4x16x16xf32>
    %42 = arith.divf %38, %41 : vector<4x16x16xf32>
    "tpu.trace_start"() <{level = 10 : i32, message = "nqk,nkd->nqd"}> : () -> ()
    %cst_24 = arith.constant dense<0.000000e+00> : vector<4x16x32xf32>
    %43 = tpu.matmul %42, %24, %cst_24 {dimension_numbers = #tpu.dot_dimension_numbers<[2], [1], [1], [2], [0, 0, 0, 1, 1, 2], [0], [0]>} : vector<4x16x16xf32>, vector<4x16x32xf32>, vector<4x16x32xf32> -> vector<4x16x32xf32>
    "tpu.trace_stop"() : () -> ()
    %cst_25 = arith.constant dense<0.000000e+00> : vector<16x32xf32>
    %44 = vector.multi_reduction <add>, %43, %cst_25 [0] : vector<4x16x32xf32> to vector<16x32xf32>
    %c0_26 = arith.constant 0 : index
    %c0_27 = arith.constant 0 : index
    %45 = vector.load %arg9[%c0_26, %c0_27] : memref<32x32xf32, #tpu.memory_space<vmem>>, vector<32x32xf32>
    %cst_28 = arith.constant dense<0.000000e+00> : vector<16x32xf32>
    %46 = tpu.matmul %44, %45, %cst_28 {dimension_numbers = #tpu.dot_dimension_numbers<[1], [0], [0], [1], [0, 0, 1, 1], [], []>} : vector<16x32xf32>, vector<32x32xf32>, vector<16x32xf32> -> vector<16x32xf32>
    %c0_29 = arith.constant 0 : index
    %c0_30 = arith.constant 0 : index
    %47 = vector.load %arg10[%c0_29, %c0_30] : memref<1x32xf32, #tpu.memory_space<vmem>>, vector<1x32xf32>
    %48 = vector.broadcast %47 : vector<1x32xf32> to vector<16x32xf32>
    %49 = arith.addf %46, %48 : vector<16x32xf32>
    %50 = arith.addf %0, %49 : vector<16x32xf32>
    %c0_31 = arith.constant 0 : index
    %c0_32 = arith.constant 0 : index
    %51 = vector.load %arg11[%c0_31, %c0_32] : memref<1x32xf32, #tpu.memory_space<vmem>>, vector<1x32xf32>
    %c0_33 = arith.constant 0 : index
    %c0_34 = arith.constant 0 : index
    %52 = vector.load %arg12[%c0_33, %c0_34] : memref<1x32xf32, #tpu.memory_space<vmem>>, vector<1x32xf32>
    %cst_35 = arith.constant dense<0.000000e+00> : vector<16xf32>
    %53 = vector.multi_reduction <add>, %50, %cst_35 [1] : vector<16x32xf32> to vector<16xf32>
    %54 = vector.shape_cast %53 : vector<16xf32> to vector<16x1xf32>
    %cst_36 = arith.constant 3.200000e+01 : f32
    %55 = vector.broadcast %cst_36 : f32 to vector<16x1xf32>
    %56 = arith.divf %54, %55 : vector<16x1xf32>
    %57 = vector.broadcast %56 : vector<16x1xf32> to vector<16x32xf32>
    %58 = arith.subf %50, %57 : vector<16x32xf32>
    %59 = arith.mulf %58, %58 : vector<16x32xf32>
    %cst_37 = arith.constant dense<0.000000e+00> : vector<16xf32>
    %60 = vector.multi_reduction <add>, %59, %cst_37 [1] : vector<16x32xf32> to vector<16xf32>
    %61 = vector.shape_cast %60 : vector<16xf32> to vector<16x1xf32>
    %cst_38 = arith.constant 3.200000e+01 : f32
    %62 = vector.broadcast %cst_38 : f32 to vector<16x1xf32>
    %63 = arith.divf %61, %62 : vector<16x1xf32>
    %cst_39 = arith.constant 9.99999996E-13 : f32
    %64 = vector.broadcast %cst_39 : f32 to vector<16x1xf32>
    %65 = arith.addf %63, %64 : vector<16x1xf32>
    %66 = math.rsqrt %65 : vector<16x1xf32>
    %67 = vector.broadcast %66 : vector<16x1xf32> to vector<16x32xf32>
    %68 = arith.mulf %58, %67 : vector<16x32xf32>
    %69 = vector.broadcast %51 : vector<1x32xf32> to vector<16x32xf32>
    %70 = arith.mulf %69, %68 : vector<16x32xf32>
    %71 = vector.broadcast %52 : vector<1x32xf32> to vector<16x32xf32>
    %72 = arith.addf %70, %71 : vector<16x32xf32>
    %c0_40 = arith.constant 0 : index
    %c0_41 = arith.constant 0 : index
    %73 = vector.load %arg13[%c0_40, %c0_41] : memref<32x64xf32, #tpu.memory_space<vmem>>, vector<32x64xf32>
    %cst_42 = arith.constant dense<0.000000e+00> : vector<16x64xf32>
    %74 = tpu.matmul %72, %73, %cst_42 {dimension_numbers = #tpu.dot_dimension_numbers<[1], [0], [0], [1], [0, 0, 1, 1], [], []>} : vector<16x32xf32>, vector<32x64xf32>, vector<16x64xf32> -> vector<16x64xf32>
    %c0_43 = arith.constant 0 : index
    %c0_44 = arith.constant 0 : index
    %75 = vector.load %arg14[%c0_43, %c0_44] : memref<1x64xf32, #tpu.memory_space<vmem>>, vector<1x64xf32>
    %76 = vector.broadcast %75 : vector<1x64xf32> to vector<16x64xf32>
    %77 = arith.addf %74, %76 : vector<16x64xf32>
    %cst_45 = arith.constant 5.000000e-01 : f32
    %78 = vector.broadcast %cst_45 : f32 to vector<16x64xf32>
    %79 = arith.mulf %77, %78 : vector<16x64xf32>
    %cst_46 = arith.constant 0.707106769 : f32
    %80 = vector.broadcast %cst_46 : f32 to vector<16x64xf32>
    %81 = arith.mulf %77, %80 : vector<16x64xf32>
    %82 = math.erf %81 : vector<16x64xf32>
    %cst_47 = arith.constant 1.000000e+00 : f32
    %83 = vector.broadcast %cst_47 : f32 to vector<16x64xf32>
    %84 = arith.addf %83, %82 : vector<16x64xf32>
    %85 = arith.mulf %79, %84 : vector<16x64xf32>
    %c0_48 = arith.constant 0 : index
    %c0_49 = arith.constant 0 : index
    %86 = vector.load %arg15[%c0_48, %c0_49] : memref<64x32xf32, #tpu.memory_space<vmem>>, vector<64x32xf32>
    %cst_50 = arith.constant dense<0.000000e+00> : vector<16x32xf32>
    %87 = tpu.matmul %85, %86, %cst_50 {dimension_numbers = #tpu.dot_dimension_numbers<[1], [0], [0], [1], [0, 0, 1, 1], [], []>} : vector<16x64xf32>, vector<64x32xf32>, vector<16x32xf32> -> vector<16x32xf32>
    %c0_51 = arith.constant 0 : index
    %c0_52 = arith.constant 0 : index
    %88 = vector.load %arg16[%c0_51, %c0_52] : memref<1x32xf32, #tpu.memory_space<vmem>>, vector<1x32xf32>
    %89 = vector.broadcast %88 : vector<1x32xf32> to vector<16x32xf32>
    %90 = arith.addf %87, %89 : vector<16x32xf32>
    %91 = arith.addf %72, %90 : vector<16x32xf32>
    %c0_53 = arith.constant 0 : index
    %c0_54 = arith.constant 0 : index
    %92 = vector.load %arg17[%c0_53, %c0_54] : memref<1x32xf32, #tpu.memory_space<vmem>>, vector<1x32xf32>
    %c0_55 = arith.constant 0 : index
    %c0_56 = arith.constant 0 : index
    %93 = vector.load %arg18[%c0_55, %c0_56] : memref<1x32xf32, #tpu.memory_space<vmem>>, vector<1x32xf32>
    %cst_57 = arith.constant dense<0.000000e+00> : vector<16xf32>
    %94 = vector.multi_reduction <add>, %91, %cst_57 [1] : vector<16x32xf32> to vector<16xf32>
    %95 = vector.shape_cast %94 : vector<16xf32> to vector<16x1xf32>
    %cst_58 = arith.constant 3.200000e+01 : f32
    %96 = vector.broadcast %cst_58 : f32 to vector<16x1xf32>
    %97 = arith.divf %95, %96 : vector<16x1xf32>
    %98 = vector.broadcast %97 : vector<16x1xf32> to vector<16x32xf32>
    %99 = arith.subf %91, %98 : vector<16x32xf32>
    %100 = arith.mulf %99, %99 : vector<16x32xf32>
    %cst_59 = arith.constant dense<0.000000e+00> : vector<16xf32>
    %101 = vector.multi_reduction <add>, %100, %cst_59 [1] : vector<16x32xf32> to vector<16xf32>
    %102 = vector.shape_cast %101 : vector<16xf32> to vector<16x1xf32>
    %cst_60 = arith.constant 3.200000e+01 : f32
    %103 = vector.broadcast %cst_60 : f32 to vector<16x1xf32>
    %104 = arith.divf %102, %103 : vector<16x1xf32>
    %cst_61 = arith.constant 9.99999996E-13 : f32
    %105 = vector.broadcast %cst_61 : f32 to vector<16x1xf32>
    %106 = arith.addf %104, %105 : vector<16x1xf32>
    %107 = math.rsqrt %106 : vector<16x1xf32>
    %108 = vector.broadcast %107 : vector<16x1xf32> to vector<16x32xf32>
    %109 = arith.mulf %99, %108 : vector<16x32xf32>
    %110 = vector.broadcast %92 : vector<1x32xf32> to vector<16x32xf32>
    %111 = arith.mulf %110, %109 : vector<16x32xf32>
    %112 = vector.broadcast %93 : vector<1x32xf32> to vector<16x32xf32>
    %113 = arith.addf %111, %112 : vector<16x32xf32>
    %c0_62 = arith.constant 0 : index
    %c0_63 = arith.constant 0 : index
    %114 = vector.load %arg19[%c0_62, %c0_63] : memref<16x32xf32, #tpu.memory_space<vmem>>, vector<16x32xf32>
    tpu.vector_store %arg19[%c0_62, %c0_63], %113 {strides = array<i32>} : memref<16x32xf32, #tpu.memory_space<vmem>>, vector<16x32xf32>,
    return
  }
}

</mosaic_0001>

<bundles_post_ra>
// kernel: tpu_custom_call.1
= control target key start
LH: loop header
LB: loop body
LE: loop exit
PB: predicated region body
PF: predicated region fallthrough
CT: control target
= control target key end

     0   :  { %s2391_s0 = inlined_call_operand.hbm [shape: f32[16,32], index: 0, kind: input, shape index: {}]   ;;  %s2392_s1 = inlined_call_operand.hbm [shape: f32[16,16], index: 1, kind: input, shape index: {}]   ;;  %s2393_s2 = inlined_call_operand.hbm [shape: f32[4,1,32], index: 2, kind: input, shape index: {}]   ;;  %s2394_s3 = inlined_call_operand.vmem [shape: f32[32,32], index: 3, kind: input, shape index: {}]   ;;  %s2395_s4 = inlined_call_operand.vmem [shape: f32[1,32], index: 4, kind: input, shape index: {}]   ;;  %s2396_s5 = inlined_call_operand.vmem [shape: f32[32,32], index: 5, kind: input, shape index: {}]   ;;  %s2397_s6 = inlined_call_operand.vmem [shape: f32[1,32], index: 6, kind: input, shape index: {}]   ;;  %s2398_s7 = inlined_call_operand.vmem [shape: f32[32,32], index: 7, kind: input, shape index: {}]   ;;  %s2399_s8 = inlined_call_operand.vmem [shape: f32[1,32], index: 8, kind: input, shape index: {}]   ;;  %s2400_s9 = inlined_call_operand.hbm [shape: f32[32,32], index: 9, kind: input, shape index: {}]   ;;  %s2401_s10 = inlined_call_operand.vmem [shape: f32[1,32], index: 10, kind: input, shape index: {}]   ;;  %s2402_s11 = inlined_call_operand.vmem [shape: f32[1,32], index: 11, kind: input, shape index: {}]   ;;  %s2403_s12 = inlined_call_operand.vmem [shape: f32[1,32], index: 12, kind: input, shape index: {}]   ;;  %s2404_s13 = inlined_call_operand.hbm [shape: f32[32,64], index: 13, kind: input, shape index: {}]   ;;  %s2405_s14 = inlined_call_operand.vmem [shape: f32[1,64], index: 14, kind: input, shape index: {}]   ;;  %s2406_s15 = inlined_call_operand.vmem [shape: f32[64,32], index: 15, kind: input, shape index: {}]   ;;  %s2407_s16 = inlined_call_operand.vmem [shape: f32[1,32], index: 16, kind: input, shape index: {}]   ;;  %s2408_s17 = inlined_call_operand.vmem [shape: f32[1,32], index: 17, kind: input, shape index: {}]   ;;  %s2409_s18 = inlined_call_operand.vmem [shape: f32[1,32], index: 18, kind: input, shape index: {}]   ;;  %s2410_s19 = inlined_call_operand.hbm [shape: f32[16,32], index: 19, kind: output, shape index: {}]  }
   0x1   :  { %2412 = sst [smem:[#allocation16_spill]] %s2391_s0 }
   0x2   :  { %2413 = sst [smem:[#allocation17_spill]] %s2392_s1 }
   0x3   :  { %2414 = sst [smem:[#allocation18_spill]] %s2393_s2 }
   0x4   :  { %2415 = sst [smem:[#allocation19_spill]] %s2394_s3 }
   0x5   :  { %24 = vsyncpa [#allocation3], 0 }
   0x6   :  { %25 = vsyncpa [#allocation6], 0 }
   0x7   :  { %26 = vsyncpa [#allocation9], 0 }
   0x8   :  { %27 = vsyncpa [#allocation4], 0  ;;  %s2042_s0 = smov [#allocation5]   ;;  %s2043_s20 = smov [#allocation8]  }
   0x9   :  { %s45_s30 = sshll.u32 %s2042_s0, 4  ;;  %s81_s21 = sshll.u32 %s2043_s20, 4  ;;  %s46_s30 = int_to_ptr.vmem [resolvable:$true] %s45_s30  ;;  %s82_s21 = int_to_ptr.vmem [resolvable:$true] %s81_s21 }
   0xa   :  { %s1922_s1 = scalar_lea.vmem %s46_s30, 256  ;;  %p1927_p1 = scmp.lt.s32.totalorder %s46_s30, %s46_s30 }
   0xb   :  { %p1923_p0 = scmp.ne.s32.totalorder %s46_s30, %s1922_s1  ;;  %p1928_p2 = scmp.lt.s32.totalorder %s1922_s1, %s1922_s1 }
   0xd   :  { %p1929_p3 = por %p1928_p2, %p1927_p1 }
   0xf   :  { %p1930_p4 = pnand %p1929_p3, %p1923_p0 }
  0x11   :  { %1933 = shalt.err (!%p1930_p4)
}
  0x12   :  { %s2044_s22 = smov 128   ;;  %s2045_s2 = smov 8  }
  0x13   :  { %s2416_s25 = sld [smem:[#allocation17_spill]]  ;;  %s1942_s3 = scalar_lea.vmem %s82_s21, 512 }
  0x14   :  { %p1943_p5 = scmp.ne.s32.totalorder %s82_s21, %s1942_s3  ;;  %p1947_p6 = scmp.lt.s32.totalorder %s82_s21, %s82_s21 }
  0x15   :  { %p1948_p7 = scmp.lt.s32.totalorder %s1942_s3, %s1942_s3 }
  0x17   :  { %p1949_p8 = por %p1948_p7, %p1947_p6 }
  0x19   :  { %51 = dma.hbm_to_vmem [thread:$0]  %s2416_s25, 256, %s46_s30, [#allocation6], %s2044_s22, %s2044_s22, %s2045_s2  }
  0x1a   :  { %p1950_p9 = pnand %p1949_p8, %p1943_p5 }
  0x1c   :  { %1953 = shalt.err (!%p1950_p9)
}
  0x1d   :  { %87 = dma.hbm_to_vmem [thread:$0]  %s2400_s9, 512, %s82_s21, [#allocation9], %s2044_s22, %s2044_s22, %s2045_s2  }
  0x1e   :  { %s2046_s28 = smov [#allocation2]   ;;  %s2047_s0 = smov [#allocation7]  }
  0x1f   :  { %s33_s29 = sshll.u32 %s2046_s28, 4  ;;  %s57_s20 = sshll.u32 %s2047_s0, 4  ;;  %s34_s29 = int_to_ptr.vmem [resolvable:$true] %s33_s29  ;;  %s58_s20 = int_to_ptr.vmem [resolvable:$true] %s57_s20 }
  0x20   :  { %s1962_s30 = scalar_lea.vmem %s34_s29, 256  ;;  %p1967_p11 = scmp.lt.s32.totalorder %s34_s29, %s34_s29 }
  0x21   :  { %p1963_p10 = scmp.ne.s32.totalorder %s34_s29, %s1962_s30  ;;  %p1968_p12 = scmp.lt.s32.totalorder %s1962_s30, %s1962_s30 }
  0x23   :  { %p1969_p13 = por %p1968_p12, %p1967_p11 }
  0x25   :  { %p1970_p0 = pnand %p1969_p13, %p1963_p10 }
  0x27   :  { %1973 = shalt.err (!%p1970_p0)
}
  0x28   :  { %s2417_s24 = sld [smem:[#allocation16_spill]]  ;;  %s1982_s9 = scalar_lea.vmem %s58_s20, 64 }
  0x29   :  { %p1983_p1 = scmp.ne.s32.totalorder %s58_s20, %s1982_s9  ;;  %p1987_p2 = scmp.lt.s32.totalorder %s58_s20, %s58_s20 }
  0x2a   :  { %p1988_p3 = scmp.lt.s32.totalorder %s1982_s9, %s1982_s9 }
  0x2c   :  { %p1989_p4 = por %p1988_p3, %p1987_p2 }
  0x2e   :  { %39 = dma.hbm_to_vmem [thread:$0]  %s2417_s24, 256, %s34_s29, [#allocation3], %s2044_s22, %s2044_s22, %s2045_s2  }
  0x2f   :  { %p1990_p5 = pnand %p1989_p4, %p1983_p1 }
  0x31   :  { %1993 = shalt.err (!%p1990_p5)
}
  0x32   :  { %s2048_s21 = smov 16   ;;  %s2049_s25 = smov 1  }
  0x33   :  { %s2418_s27 = sld [smem:[#allocation18_spill]]  ;;  %s2050_s28 = smov [#allocation10]  }
  0x34   :  { %s99_s0 = sshll.u32 %s2050_s28, 4  ;;  %s100_s0 = int_to_ptr.vmem [resolvable:$true] %s99_s0 }
  0x35   :  { %s2002_s30 = scalar_lea.vmem %s100_s0, 512  ;;  %p2007_p7 = scmp.lt.s32.totalorder %s100_s0, %s100_s0 }
  0x36   :  { %p2003_p6 = scmp.ne.s32.totalorder %s100_s0, %s2002_s30  ;;  %p2008_p8 = scmp.lt.s32.totalorder %s2002_s30, %s2002_s30 }
  0x38   :  { %p2009_p9 = por %p2008_p8, %p2007_p7 }
  0x39   :  { %63 = dma.hbm_to_vmem [thread:$0]  %s2418_s27, 64, %s58_s20, [#allocation6], %s2048_s21, %s2048_s21, %s2049_s25  }
  0x3a   :  { %p2010_p10 = pnand %p2009_p9, %p2003_p6 }
  0x3c   :  { %2013 = shalt.err (!%p2010_p10)
}
  0x3d   :  { %105 = dma.hbm_to_vmem [thread:$0]  %s2404_s13, 512, %s100_s0, [#allocation9], %s2044_s22, %s2044_s22, %s2045_s2  }
  0x3e   :  { %2034 = dma.done.wait [#allocation3], 256  }
  0x3f   :  { %2035 = vsyncadd [#allocation3], 4294967040 }
  0x40   :  { %2036 = dma.done.wait [#allocation6], 320  }
  0x41   :  { %2037 = vsyncadd [#allocation6], 4294966976 }
  0x42   :  { %2038 = dma.done.wait [#allocation9], 1024  }
  0x43   :  { %2039 = vsyncadd [#allocation9], 4294966272  ;;  %vm144_vm0 = vcmask 261120   ;;  %s2419_s24 = sld [smem:[#allocation19_spill]]  ;;  %v2185_v2 = vld [vmem:[#allocation2] sm:$0xff]  ;;  %v315_v4 = vld [vmem:[%s2398_s7 + $0x18] sm:$0xff] }
  0x44   :  { %1738 = vmatprep.mubr.msk.f32.mxu1 %vm144_vm0, %v2185_v2  ;;  %1760 = vmatprep.mubr.msk.f32.mxu0 %vm144_vm0, %v2185_v2  ;;  %v2200_v6 = vld [vmem:[#allocation2 + $0x8] sm:$0xff]  ;;  %v229_v7 = vld [vmem:[%s2396_s5 + $0x18] sm:$0xff]  ;;  %v228_v8 = vld [vmem:[%s2396_s5 + $0x10] sm:$0xff]  ;;  %vm776_vm1 = vcmask 130048   ;;  %vm1459_vm2 = vcmask 523264   ;;  %s2051_s1 = smov [#allocation11]  }
  0x45   :  { %1752 = vmatprep.subr.mxu0 %v315_v4  ;;  %v227_v9 = vld [vmem:[%s2396_s5 + $0x8] sm:$0xff]  ;;  %v226_v10 = vld [vmem:[%s2396_s5] sm:$0xff]  ;;  %v314_v11 = vld [vmem:[%s2398_s7 + $0x10] sm:$0xff]  ;;  %s1594_s20 = sshll.u32 %s2051_s1, 4  ;;  %s1595_s20 = int_to_ptr.vmem [resolvable:$true] %s1594_s20 }
  0x46   :  { %1753 = vmatpush3.msra.mxu0 %v315_v4  ;;  %v313_v12 = vld [vmem:[%s2398_s7 + $0x8] sm:$0xff]  ;;  %v312_v13 = vld [vmem:[%s2398_s7] sm:$0xff]  ;;  %v445_v48 = vld [vmem:[#allocation5 + $0x8] sm:$0xff]  ;;  %s2014_s23 = scalar_lea.vmem %s1595_s20, 256  ;;  %p2019_p12 = scmp.lt.s32.totalorder %s1595_s20, %s1595_s20 }
  0x47   :  { %1754 = vmatprep.subr.mxu0 %v314_v11  ;;  %v1608_v15 = vld [vmem:[%s2395_s4] ss:$0 sm:$0xff]  ;;  %v2239_v22 = vld [vmem:[#allocation7 + $0x1] ss:$0 sm:$0xff]  ;;  %v1619_v30 = vld [vmem:[#allocation7 + $0x2] ss:$0 sm:$0xff]  ;;  %p2015_p11 = scmp.ne.s32.totalorder %s1595_s20, %s2014_s23  ;;  %p2020_p13 = scmp.lt.s32.totalorder %s2014_s23, %s2014_s23 }
  0x48   :  { %1755 = vmatpush3.msra.mxu0 %v314_v11  ;;  %v1611_v19 = vld [vmem:[%s2397_s6] ss:$0 sm:$0xff]  ;;  %v2247_v31 = vld [vmem:[#allocation7 + $0x3] ss:$0 sm:$0xff]  ;;  %v444_v51 = vld [vmem:[#allocation5] sm:$0xff] }
  0x49   :  { %v136_v0 = vld [vmem:[%s2419_s24 + $0x18] sm:$0xff]  ;;  %v135_v1 = vld [vmem:[%s2419_s24 + $0x10] sm:$0xff]  ;;  %v134_v3 = vld [vmem:[%s2419_s24 + $0x8] sm:$0xff]  ;;  %1756 = vmatprep.subr.mxu0 %v313_v12  ;;  %p2021_p0 = por %p2020_p13, %p2019_p12 }
  0x4a   :  { %1730 = vmatprep.subr.mxu1 %v136_v0  ;;  %v133_v5 = vld [vmem:[%s2419_s24] sm:$0xff]  ;;  %1757 = vmatpush3.msra.mxu0 %v313_v12 }
  0x4b   :  { %1731 = vmatpush3.msra.mxu1 %v136_v0  ;;  %1758 = vmatprep.subr.mxu0 %v312_v13  ;;  %v1617_v21 = vld [vmem:[#allocation7] ss:$0 sm:$0xff]  ;;  %p2022_p1 = pnand %p2021_p0, %p2015_p11 }
  0x4c   :  { %1732 = vmatprep.subr.mxu1 %v135_v1  ;;  %1759 = vmatpush3.msra.mxu0 %v312_v13  ;;  %v1614_v38 = vld [vmem:[%s2399_s8] ss:$0 sm:$0xff] }
  0x4d   :  { %1733 = vmatpush3.msra.mxu1 %v135_v1  ;;  %1761 = vmatmul.mubr.msk.f32.vlgmr.msra.gmra.mxu0 %vm144_vm0, %v2200_v6 }
  0x4e   :  { %1734 = vmatprep.subr.mxu1 %v134_v3 }
  0x4f   :  { %1735 = vmatpush3.msra.mxu1 %v134_v3 }
  0x50   :  { %1736 = vmatprep.subr.mxu1 %v133_v5 }
  0x51   :  { %1737 = vmatpush3.msra.mxu1 %v133_v5 }
  0x52   :  { %1739 = vmatmul.mubr.msk.f32.vlgmr.msra.gmra.mxu1 %vm144_vm0, %v2200_v6  ;;  %1741 = vmatprep.subr.mxu1 %v229_v7 }
  0x53   :  { %1742 = vmatpush3.msra.mxu1 %v229_v7  ;;  %1749 = vmatprep.mubr.msk.f32.mxu1 %vm144_vm0, %v2185_v2 }
  0x54   :  { %1743 = vmatprep.subr.mxu1 %v228_v8 }
  0x55   :  { %1744 = vmatpush3.msra.mxu1 %v228_v8 }
  0x56   :  { %1745 = vmatprep.subr.mxu1 %v227_v9 }
  0x57   :  { %1746 = vmatpush3.msra.mxu1 %v227_v9 }
  0x58   :  { %1747 = vmatprep.subr.mxu1 %v226_v10 }
  0x59   :  { %1748 = vmatpush3.msra.mxu1 %v226_v10 }
  0x5a   :  { %1750 = vmatmul.mubr.msk.f32.vlgmr.msra.gmra.mxu1 %vm144_vm0, %v2200_v6 }
 0x10d   :  { %v1762_v39 = vpop.f32.mrf.mxu0 }
 0x10e   :  { %v2272_v40 = vadd.f32 %v1762_v39, %v1614_v38 }
 0x10f   :  { %v389_v43 = vpop.f32.mrf.mxu0 }
 0x110   :  { %v435_v41 = vmul.f32 %v1617_v21, %v2272_v40  ;;  %v439_v42 = vmul.f32 %v1619_v30, %v2272_v40  ;;  %v2276_v44 = vadd.f32 %v1614_v38, %v389_v43  ;;  %v2282_v47 = vmul.f32 %v2239_v22, %v2272_v40 }
 0x112   :  { %v1740_v14 = vpop.f32.mrf.mxu1  ;;  %v434_v45 = vmul.f32 %v1617_v21, %v2276_v44  ;;  %v438_v46 = vmul.f32 %v1619_v30, %v2276_v44 }
 0x113   :  { %v223_v32 = vadd.f32 %v1740_v14, %v1608_v15 }
 0x114   :  { %v217_v16 = vpop.f32.mrf.mxu1 }
 0x115   :  { %v218_v17 = vadd.f32 %v1608_v15, %v217_v16  ;;  %v443_v35 = vmul.f32 0.35355338, %v223_v32 }
 0x117   :  { %v442_v18 = vmul.f32 0.35355338, %v218_v17 }
 0x119   :  { %1767 = vmatprep.mubr.msk.f32.mxu1 %vm144_vm0, %v442_v18  ;;  %1774 = vmatprep.mubr.msk.f32.mxu0 %vm144_vm0, %v442_v18 }
 0x11a   :  { %v1751_v20 = vpop.f32.mrf.mxu1 }
 0x11b   :  { %v309_v23 = vadd.f32 %v1751_v20, %v1611_v19 }
 0x11c   :  { %v303_v24 = vpop.f32.mrf.mxu1 }
 0x11d   :  { %v304_v25 = vadd.f32 %v1611_v19, %v303_v24  ;;  %v427_v26 = vmul.f32 %v1617_v21, %v309_v23  ;;  %v429_v27 = vmul.f32 %v2239_v22, %v309_v23  ;;  %v431_v33 = vmul.f32 %v1619_v30, %v309_v23 }
 0x11e   :  { %v433_v34 = vmul.f32 %v2247_v31, %v309_v23 }
 0x11f   :  { %1763 = vmatprep.subr.msk.mxu1 %vm144_vm0, %v427_v26  ;;  %1770 = vmatprep.subr.msk.mxu0 %vm144_vm0, %v429_v27  ;;  %v426_v28 = vmul.f32 %v1617_v21, %v304_v25  ;;  %v428_v29 = vmul.f32 %v2239_v22, %v304_v25  ;;  %v430_v36 = vmul.f32 %v1619_v30, %v304_v25 }
 0x120   :  { %1764 = vmatpush3.xpose.msk.msra.mxu1 %vm144_vm0, %v427_v26  ;;  %1771 = vmatpush3.xpose.msk.msra.mxu0 %vm144_vm0, %v429_v27  ;;  %v432_v37 = vmul.f32 %v2247_v31, %v304_v25 }
 0x121   :  { %1765 = vmatprep.subr.msk.mxu1 %vm144_vm0, %v426_v28  ;;  %1772 = vmatprep.subr.msk.mxu0 %vm144_vm0, %v428_v29 }
 0x124   :  { %1766 = vmatpush3.xpose.msk.msra.mxu1 %vm144_vm0, %v426_v28  ;;  %1773 = vmatpush3.xpose.msk.msra.mxu0 %vm144_vm0, %v428_v29 }
 0x125   :  { %1777 = vmatprep.subr.msk.mxu1 %vm144_vm0, %v431_v33  ;;  %1784 = vmatprep.subr.msk.mxu0 %vm144_vm0, %v433_v34 }
 0x127   :  { %1768 = vmatmul.mubr.msk.f32.vlgmr.msra.gmra.mxu1 %vm144_vm0, %v443_v35  ;;  %1775 = vmatmul.mubr.msk.f32.vlgmr.msra.gmra.mxu0 %vm144_vm0, %v443_v35 }
 0x128   :  { %1778 = vmatpush3.xpose.msk.msra.mxu1 %vm144_vm0, %v431_v33  ;;  %1781 = vmatprep.mubr.msk.f32.mxu1 %vm144_vm0, %v442_v18 }
 0x129   :  { %1785 = vmatpush3.xpose.msk.msra.mxu0 %vm144_vm0, %v433_v34  ;;  %1788 = vmatprep.mubr.msk.f32.mxu0 %vm144_vm0, %v442_v18 }
 0x12a   :  { %1779 = vmatprep.subr.msk.mxu1 %vm144_vm0, %v430_v36  ;;  %1786 = vmatprep.subr.msk.mxu0 %vm144_vm0, %v432_v37 }
 0x12c   :  { %1780 = vmatpush3.xpose.msk.msra.mxu1 %vm144_vm0, %v430_v36 }
 0x12d   :  { %1787 = vmatpush3.xpose.msk.msra.mxu0 %vm144_vm0, %v432_v37  ;;  %1791 = vmatprep.subr.mxu1 %v435_v41 }
 0x12e   :  { %1805 = vmatprep.subr.mxu0 %v439_v42 }
 0x12f   :  { %1782 = vmatmul.mubr.msk.f32.vlgmr.msra.gmra.mxu1 %vm144_vm0, %v443_v35 }
 0x130   :  { %1789 = vmatmul.mubr.msk.f32.vlgmr.msra.gmra.mxu0 %vm144_vm0, %v443_v35  ;;  %1792 = vmatpush3.msra.mxu1 %v435_v41 }
 0x131   :  { %1806 = vmatpush3.msra.mxu0 %v439_v42  ;;  %1793 = vmatprep.subr.mxu1 %v434_v45 }
 0x132   :  { %1794 = vmatpush3.msra.mxu1 %v434_v45  ;;  %1807 = vmatprep.subr.mxu0 %v438_v46 }
 0x133   :  { %1798 = vmatprep.subr.mxu1 %v2282_v47  ;;  %1808 = vmatpush3.msra.mxu0 %v438_v46 }
 0x1e7   :  { %v1769_v49 = vpop.f32.mrf.mxu1  ;;  %v1776_v50 = vpop.f32.mrf.mxu0 }
 0x1e8   :  { %v530_v52 = vadd.f32 %v1769_v49, %v445_v48  ;;  %v611_v53 = vadd.f32 %v1776_v50, %v445_v48 }
 0x1e9   :  { %v524_v54 = vpop.f32.mrf.mxu1  ;;  %v605_v55 = vpop.f32.mrf.mxu0 }
 0x1ea   :  { %v525_v56 = vadd.f32 %v524_v54, %v444_v51  ;;  %v606_v57 = vadd.f32 %v605_v55, %v444_v51  ;;  %v786_v58 = vsel %vm776_vm1, %v611_v53, -inf  ;;  %v780_v59 = vsel %vm776_vm1, %v530_v52, -inf }
 0x1eb   :  { %787 = vmax.xlane.f32.xlu1 %v786_v58  ;;  %781 = vmax.xlane.f32.xlu0 %v780_v59 }
 0x1ec   :  { %v783_v60 = vsel %vm776_vm1, %v606_v57, -inf  ;;  %v777_v61 = vsel %vm776_vm1, %v525_v56, -inf }
 0x1ef   :  { %784 = vmax.xlane.f32.xlu1 %v783_v60  ;;  %v1783_v62 = vpop.f32.mrf.mxu1  ;;  %778 = vmax.xlane.f32.xlu0 %v777_v61 }
 0x1f0   :  { %v1790_v63 = vpop.f32.mrf.mxu0  ;;  %v692_v0 = vadd.f32 %v1783_v62, %v445_v48 }
 0x1f1   :  { %v686_v1 = vpop.f32.mrf.mxu1  ;;  %v773_v3 = vadd.f32 %v1790_v63, %v445_v48 }
 0x1f2   :  { %v687_v4 = vadd.f32 %v686_v1, %v444_v51  ;;  %v767_v5 = vpop.f32.mrf.mxu0  ;;  %v792_v7 = vsel %vm776_vm1, %v692_v0, -inf }
 0x1f3   :  { %793 = vmax.xlane.f32.xlu1 %v792_v7  ;;  %v768_v8 = vadd.f32 %v767_v5, %v444_v51  ;;  %v798_v10 = vsel %vm776_vm1, %v773_v3, -inf }
 0x1f4   :  { %v789_v9 = vsel %vm776_vm1, %v687_v4, -inf }
 0x1f5   :  { %790 = vmax.xlane.f32.xlu0 %v789_v9  ;;  %v795_v11 = vsel %vm776_vm1, %v768_v8, -inf  ;;  %v436_v9 = vmul.f32 %v2239_v22, %v2276_v44 }
 0x1f7   :  { %799 = vmax.xlane.f32.xlu1 %v798_v10 }
 0x1f9   :  { %796 = vmax.xlane.f32.xlu0 %v795_v11  ;;  %v441_v11 = vmul.f32 %v2247_v31, %v2272_v40 }
 0x274   :  { %v788_v12 = vpop.xlane.xlu1 %787  ;;  %v782_v13 = vpop.xlane.xlu0 %781 }
 0x275   :  { %v804_v14 = vsub.f32 %v611_v53, %v788_v12  ;;  %v802_v15 = vsub.f32 %v530_v52, %v782_v13 }
 0x277   :  { %v811_v16 = vmul.f32 1.442695, %v802_v15  ;;  %v815_v17 = vmul.f32 1.442695, %v804_v14  ;;  %v440_v15 = vmul.f32 %v2247_v31, %v2276_v44  ;;  %v1205_v31 = vld [vmem:[#allocation8 + $0x10] sm:$0xff]  ;;  %v1204_v44 = vld [vmem:[#allocation8 + $0x8] sm:$0xff] }
 0x278   :  { %v785_v18 = vpop.xlane.xlu1 %784  ;;  %v779_v19 = vpop.xlane.xlu0 %778 }
 0x279   :  { %v803_v20 = vsub.f32 %v606_v57, %v785_v18  ;;  %v801_v21 = vsub.f32 %v525_v56, %v779_v19  ;;  %1870 = vpow2.f32 %v811_v16  ;;  %v1206_v19 = vld [vmem:[#allocation8 + $0x18] sm:$0xff] }
 0x27a   :  { %1872 = vpow2.f32 %v815_v17  ;;  %1819 = vmatprep.subr.mxu0 %v1206_v19 }
 0x27b   :  { %v809_v23 = vmul.f32 1.442695, %v801_v21  ;;  %v813_v24 = vmul.f32 1.442695, %v803_v20  ;;  %v1203_v20 = vld [vmem:[#allocation8] sm:$0xff] }
 0x27c   :  { %v794_v25 = vpop.xlane.xlu1 %793 }
 0x27d   :  { %v806_v26 = vsub.f32 %v692_v0, %v794_v25  ;;  %1874 = vpow2.f32 %v809_v23 }
 0x27e   :  { %v791_v27 = vpop.xlane.xlu0 %790  ;;  %1876 = vpow2.f32 %v813_v24 }
 0x27f   :  { %v819_v28 = vmul.f32 1.442695, %v806_v26  ;;  %v805_v29 = vsub.f32 %v687_v4, %v791_v27 }
 0x280   :  { %v800_v30 = vpop.xlane.xlu1 %799 }
 0x281   :  { %1878 = vpow2.f32 %v819_v28  ;;  %v817_v32 = vmul.f32 1.442695, %v805_v29  ;;  %v808_v33 = vsub.f32 %v773_v3, %v800_v30 }
 0x282   :  { %v797_v34 = vpop.xlane.xlu0 %796 }
 0x283   :  { %v823_v35 = vmul.f32 1.442695, %v808_v33  ;;  %v807_v36 = vsub.f32 %v768_v8, %v797_v34  ;;  %1880 = vpow2.f32 %v817_v32 }
 0x285   :  { %1882 = vpow2.f32 %v823_v35  ;;  %v821_v37 = vmul.f32 1.442695, %v807_v36 }
 0x286   :  { %v1871_v38 = vpop.eup %1870 }
 0x287   :  { %1884 = vpow2.f32 %v821_v37  ;;  %v828_v39 = vsel %vm776_vm1, %v1871_v38, 0.0  ;;  %v1873_v41 = vpop.eup %1872 }
 0x288   :  { %829 = vadd.xlane.f32.xlu1 %v828_v39  ;;  %v834_v43 = vsel %vm776_vm1, %v1873_v41, 0.0 }
 0x28a   :  { %v1875_v42 = vpop.eup %1874 }
 0x28b   :  { %v825_v45 = vsel %vm776_vm1, %v1875_v42, 0.0  ;;  %v1877_v46 = vpop.eup %1876 }
 0x28c   :  { %835 = vadd.xlane.f32.xlu1 %v834_v43  ;;  %826 = vadd.xlane.f32.xlu0 %v825_v45  ;;  %v831_v50 = vsel %vm776_vm1, %v1877_v46, 0.0 }
 0x28e   :  { %v1879_v48 = vpop.eup %1878 }
 0x28f   :  { %v840_v49 = vsel %vm776_vm1, %v1879_v48, 0.0 }
 0x290   :  { %v1881_v51 = vpop.eup %1880  ;;  %841 = vadd.xlane.f32.xlu1 %v840_v49  ;;  %832 = vadd.xlane.f32.xlu0 %v831_v50 }
 0x291   :  { %v837_v54 = vsel %vm776_vm1, %v1881_v51, 0.0 }
 0x292   :  { %v1883_v52 = vpop.eup %1882 }
 0x293   :  { %v846_v53 = vsel %vm776_vm1, %v1883_v52, 0.0 }
 0x294   :  { %v1885_v55 = vpop.eup %1884  ;;  %847 = vadd.xlane.f32.xlu1 %v846_v53  ;;  %838 = vadd.xlane.f32.xlu0 %v837_v54 }
 0x295   :  { %v843_v56 = vsel %vm776_vm1, %v1885_v55, 0.0 }
 0x298   :  { %844 = vadd.xlane.f32.xlu0 %v843_v56 }
 0x311   :  { %v830_v57 = vpop.xlane.xlu1 %829 }
 0x312   :  { %1886 = vrcp.f32 %v830_v57 }
 0x315   :  { %v836_v58 = vpop.xlane.xlu1 %835  ;;  %v827_v59 = vpop.xlane.xlu0 %826 }
 0x316   :  { %1888 = vrcp.f32 %v827_v59 }
 0x317   :  { %1890 = vrcp.f32 %v836_v58 }
 0x319   :  { %v842_v60 = vpop.xlane.xlu1 %841  ;;  %v833_v61 = vpop.xlane.xlu0 %832 }
 0x31a   :  { %1892 = vrcp.f32 %v833_v61 }
 0x31b   :  { %1894 = vrcp.f32 %v842_v60 }
 0x31d   :  { %v839_v62 = vpop.xlane.xlu0 %838  ;;  %v848_v63 = vpop.xlane.xlu1 %847 }
 0x31e   :  { %1896 = vrcp.f32 %v839_v62 }
 0x31f   :  { %1898 = vrcp.f32 %v848_v63  ;;  %v1887_v1 = vpop.eup %1886 }
 0x320   :  { %v852_v5 = vmul.f32 %v1887_v1, %v1871_v38 }
 0x321   :  { %v845_v0 = vpop.xlane.xlu0 %844 }
 0x322   :  { %1900 = vrcp.f32 %v845_v0 }
 0x323   :  { %v1889_v3 = vpop.eup %1888 }
 0x324   :  { %v850_v4 = vmul.f32 %v1889_v3, %v1875_v42  ;;  %v1891_v7 = vpop.eup %1890  ;;  %v1345_v3 = vld [vmem:[#allocation10 + $0x18] sm:$0xff] }
 0x325   :  { %v856_v12 = vmul.f32 %v1891_v7, %v1873_v41 }
 0x326   :  { %1795 = vmatprep.mubr.msk.f32.mxu1 %vm776_vm1, %v850_v4  ;;  %v1343_v4 = vld [vmem:[#allocation10 + $0x8] sm:$0xff] }
 0x327   :  { %v1893_v8 = vpop.eup %1892  ;;  %1796 = vmatmul.mubr.msk.f32.vlgmr.msra.gmra.mxu1 %vm776_vm1, %v852_v5  ;;  %v1342_v5 = vld [vmem:[#allocation10] sm:$0xff] }
 0x328   :  { %1799 = vmatpush3.msra.mxu1 %v2282_v47  ;;  %v854_v10 = vmul.f32 %v1893_v8, %v1877_v46  ;;  %v1895_v13 = vpop.eup %1894 }
 0x329   :  { %1800 = vmatprep.subr.mxu1 %v436_v9  ;;  %v860_v16 = vmul.f32 %v1895_v13, %v1879_v48  ;;  %v1645_v48 = vld [vmem:[%s2401_s10] ss:$0 sm:$0xff] }
 0x32a   :  { %1801 = vmatpush3.msra.mxu1 %v436_v9  ;;  %1802 = vmatprep.mubr.msk.f32.mxu1 %vm776_vm1, %v854_v10 }
 0x32b   :  { %v1897_v14 = vpop.eup %1896  ;;  %1812 = vmatprep.subr.mxu1 %v441_v11  ;;  %1803 = vmatmul.mubr.msk.f32.vlgmr.msra.gmra.mxu1 %vm776_vm1, %v856_v12 }
 0x32c   :  { %1813 = vmatpush3.msra.mxu1 %v441_v11  ;;  %v858_v22 = vmul.f32 %v1897_v14, %v1881_v51  ;;  %v1899_v47 = vpop.eup %1898  ;;  %v1648_v14 = vld [vmem:[%s2402_s11] ss:$0 sm:$0xff] }
 0x32d   :  { %1814 = vmatprep.subr.mxu1 %v440_v15  ;;  %v864_v18 = vmul.f32 %v1899_v47, %v1883_v52 }
 0x32e   :  { %1815 = vmatpush3.msra.mxu1 %v440_v15  ;;  %1809 = vmatprep.mubr.msk.f32.mxu0 %vm776_vm1, %v858_v22 }
 0x32f   :  { %v1901_v17 = vpop.eup %1900  ;;  %1810 = vmatmul.mubr.msk.f32.vlgmr.msra.gmra.mxu0 %vm776_vm1, %v860_v16  ;;  %1830 = vmatprep.subr.mxu1 %v1345_v3 }
 0x330   :  { %v862_v40 = vmul.f32 %v1901_v17, %v1885_v55  ;;  %1820 = vmatpush3.msra.mxu0 %v1206_v19  ;;  %v1649_v17 = vld [vmem:[%s2403_s12] ss:$0 sm:$0xff] }
 0x331   :  { %1821 = vmatprep.subr.mxu0 %v1205_v31 }
 0x332   :  { %1816 = vmatprep.mubr.msk.f32.mxu1 %vm776_vm1, %v862_v40  ;;  %1822 = vmatpush3.msra.mxu0 %v1205_v31  ;;  %v1451_v31 = vld [vmem:[%s2406_s15 + $0x38] sm:$0xff] }
 0x333   :  { %1817 = vmatmul.mubr.msk.f32.vlgmr.msra.gmra.mxu1 %vm776_vm1, %v864_v18  ;;  %1823 = vmatprep.subr.mxu0 %v1204_v44 }
 0x334   :  { %1824 = vmatpush3.msra.mxu0 %v1204_v44  ;;  %1831 = vmatpush3.msra.mxu1 %v1345_v3  ;;  %v1450_v44 = vld [vmem:[%s2406_s15 + $0x30] sm:$0xff] }
 0x335   :  { %1825 = vmatprep.subr.mxu0 %v1203_v20 }
 0x336   :  { %1826 = vmatpush3.msra.mxu0 %v1203_v20  ;;  %v1449_v20 = vld [vmem:[%s2406_s15 + $0x28] sm:$0xff] }
 0x337   :  { %1841 = vmatprep.subr.mxu0 %v1451_v31 }
 0x3e7   :  { %v1797_v21 = vpop.f32.mrf.mxu1 }
 0x3e8   :  { %v1196_v32 = vsel %vm144_vm0, %v1797_v21, 0.0  ;;  %v1448_v21 = vld [vmem:[%s2406_s15 + $0x20] sm:$0xff] }
 0x3e9   :  { %v937_v23 = vpop.f32.mrf.mxu1 }
 0x3ea   :  { %v1189_v29 = vsel %vm144_vm0, %v937_v23, 0.0  ;;  %v1447_v23 = vld [vmem:[%s2406_s15 + $0x18] sm:$0xff] }
 0x3eb   :  { %v1804_v24 = vpop.f32.mrf.mxu1 }
 0x3ec   :  { %v1197_v28 = vsel %vm144_vm0, %v1804_v24, 0.0  ;;  %v1446_v24 = vld [vmem:[%s2406_s15 + $0x10] sm:$0xff] }
 0x3ed   :  { %v1018_v25 = vpop.f32.mrf.mxu1  ;;  %v1198_v37 = vadd.f32 %v1197_v28, %v1196_v32 }
 0x3ee   :  { %v1190_v26 = vsel %vm144_vm0, %v1018_v25, 0.0  ;;  %v1445_v25 = vld [vmem:[%s2406_s15 + $0x8] sm:$0xff] }
 0x3ef   :  { %v1811_v27 = vpop.f32.mrf.mxu0  ;;  %v1191_v33 = vadd.f32 %v1190_v26, %v1189_v29  ;;  %v1444_v26 = vld [vmem:[%s2406_s15] sm:$0xff] }
 0x3f0   :  { %v1199_v34 = vsel %vm144_vm0, %v1811_v27, 0.0  ;;  %v1650_v27 = vld [vmem:[%s2405_s14] ss:$0 sm:$0xff] }
 0x3f1   :  { %v1099_v30 = vpop.f32.mrf.mxu0  ;;  %v1200_v42 = vadd.f32 %v1199_v34, %v1198_v37 }
 0x3f2   :  { %v1192_v35 = vsel %vm144_vm0, %v1099_v30, 0.0 }
 0x3f3   :  { %v1818_v36 = vpop.f32.mrf.mxu1  ;;  %v1193_v38 = vadd.f32 %v1192_v35, %v1191_v33 }
 0x3f4   :  { %v1201_v39 = vsel %vm144_vm0, %v1818_v36, 0.0 }
 0x3f5   :  { %v1180_v41 = vpop.f32.mrf.mxu1  ;;  %v1202_v46 = vadd.f32 %v1201_v39, %v1200_v42 }
 0x3f6   :  { %v1194_v43 = vsel %vm144_vm0, %v1180_v41, 0.0 }
 0x3f7   :  { %v1195_v45 = vadd.f32 %v1194_v43, %v1193_v38 }
 0x3f9   :  { %1827 = vmatprep.mubr.msk.f32.mxu0 %vm144_vm0, %v1195_v45  ;;  %v1653_v45 = vld [vmem:[%s2407_s16] ss:$0 sm:$0xff] }
 0x3fa   :  { %1828 = vmatmul.mubr.msk.f32.vlgmr.msra.gmra.mxu0 %vm144_vm0, %v1202_v46 }
 0x3fb   :  { %1842 = vmatpush3.msra.mxu0 %v1451_v31 }
 0x3fc   :  { %1843 = vmatprep.subr.mxu0 %v1450_v44 }
 0x3fd   :  { %1844 = vmatpush3.msra.mxu0 %v1450_v44 }
 0x3fe   :  { %1845 = vmatprep.subr.mxu0 %v1449_v20 }
 0x3ff   :  { %1846 = vmatpush3.msra.mxu0 %v1449_v20 }
 0x400   :  { %1847 = vmatprep.subr.mxu0 %v1448_v21 }
 0x401   :  { %1848 = vmatpush3.msra.mxu0 %v1448_v21 }
 0x402   :  { %1849 = vmatprep.subr.mxu0 %v1447_v23 }
 0x403   :  { %1850 = vmatpush3.msra.mxu0 %v1447_v23 }
 0x404   :  { %1851 = vmatprep.subr.mxu0 %v1446_v24 }
 0x405   :  { %1852 = vmatpush3.msra.mxu0 %v1446_v24 }
 0x406   :  { %1853 = vmatprep.subr.mxu0 %v1445_v25 }
 0x407   :  { %1854 = vmatpush3.msra.mxu0 %v1445_v25 }
 0x408   :  { %1855 = vmatprep.subr.mxu0 %v1444_v26 }
 0x409   :  { %1856 = vmatpush3.msra.mxu0 %v1444_v26 }
 0x4ba   :  { %v1829_v49 = vpop.f32.mrf.mxu0 }
 0x4bb   :  { %v1292_v50 = vadd.f32 %v1829_v49, %v1645_v48 }
 0x4bc   :  { %v1286_v51 = vpop.f32.mrf.mxu0 }
 0x4bd   :  { %v1287_v52 = vadd.f32 %v1645_v48, %v1286_v51  ;;  %v1296_v53 = vadd.f32 %v1292_v50, %v2200_v6 }
 0x4bf   :  { %v1302_v54 = vsel %vm144_vm0, %v1296_v53, 0.0  ;;  %v1295_v55 = vadd.f32 %v1287_v52, %v2185_v2  ;;  %v1344_v2 = vld [vmem:[#allocation10 + $0x10] sm:$0xff] }
 0x4c0   :  { %1303 = vadd.xlane.f32.xlu1 %v1302_v54  ;;  %1832 = vmatprep.subr.mxu1 %v1344_v2 }
 0x4c1   :  { %v1299_v56 = vsel %vm144_vm0, %v1295_v55, 0.0  ;;  %1833 = vmatpush3.msra.mxu1 %v1344_v2 }
 0x4c2   :  { %1300 = vadd.xlane.f32.xlu0 %v1299_v56  ;;  %1834 = vmatprep.subr.mxu1 %v1343_v4 }
 0x4c3   :  { %1835 = vmatpush3.msra.mxu1 %v1343_v4 }
 0x4c4   :  { %1836 = vmatprep.subr.mxu1 %v1342_v5 }
 0x4c5   :  { %1837 = vmatpush3.msra.mxu1 %v1342_v5 }
 0x549   :  { %v1304_v57 = vpop.xlane.xlu1 %1303 }
 0x54a   :  { %v1307_v58 = vmul.f32 0.03125, %v1304_v57 }
 0x54b   :  { %v1301_v59 = vpop.xlane.xlu0 %1300 }
 0x54c   :  { %v1309_v60 = vsub.f32 %v1296_v53, %v1307_v58  ;;  %v1306_v61 = vmul.f32 0.03125, %v1301_v59 }
 0x54e   :  { %v1308_v62 = vsub.f32 %v1295_v55, %v1306_v61  ;;  %v1311_v63 = vmul.f32 %v1309_v60, %v1309_v60 }
 0x550   :  { %v1315_v0 = vsel %vm144_vm0, %v1311_v63, 0.0  ;;  %v1310_v1 = vmul.f32 %v1308_v62, %v1308_v62 }
 0x551   :  { %1316 = vadd.xlane.f32.xlu1 %v1315_v0 }
 0x552   :  { %v1312_v6 = vsel %vm144_vm0, %v1310_v1, 0.0 }
 0x553   :  { %1313 = vadd.xlane.f32.xlu0 %v1312_v6 }
 0x5da   :  { %v1317_v7 = vpop.xlane.xlu1 %1316 }
 0x5db   :  { %v1319_v8 = vmul.f32 0.03125, %v1317_v7 }
 0x5dc   :  { %v1314_v9 = vpop.xlane.xlu0 %1313 }
 0x5dd   :  { %v1321_v10 = vadd.f32 1e-12, %v1319_v8  ;;  %v1318_v11 = vmul.f32 0.03125, %v1314_v9  ;;  %v1656_v8 = vld [vmem:[%s2408_s17] ss:$0 sm:$0xff] }
 0x5df   :  { %1902 = vrsqrt.f32 %v1321_v10  ;;  %v1320_v12 = vadd.f32 1e-12, %v1318_v11  ;;  %v1657_v11 = vld [vmem:[%s2409_s18] ss:$0 sm:$0xff] }
 0x5e1   :  { %1904 = vrsqrt.f32 %v1320_v12 }
 0x5ec   :  { %v1903_v13 = vpop.eup %1902 }
 0x5ed   :  { %v1325_v15 = vmul.f32 %v1903_v13, %v1309_v60 }
 0x5ee   :  { %v1905_v22 = vpop.eup %1904 }
 0x5ef   :  { %v1324_v47 = vmul.f32 %v1905_v22, %v1308_v62  ;;  %v1333_v16 = vmul.f32 %v1648_v14, %v1325_v15 }
 0x5f1   :  { %v1332_v40 = vmul.f32 %v1648_v14, %v1324_v47  ;;  %v1341_v19 = vadd.f32 %v1649_v17, %v1333_v16 }
 0x5f3   :  { %v1340_v18 = vadd.f32 %v1649_v17, %v1332_v40 }
 0x5f5   :  { %1838 = vmatprep.mubr.msk.f32.mxu1 %vm144_vm0, %v1340_v18 }
 0x5f6   :  { %1839 = vmatmul.mubr.msk.f32.vlgmr.msra.gmra.mxu1 %vm144_vm0, %v1341_v19 }
 0x6b6   :  { %v1840_v28 = vpop.f32.mrf.mxu1 }
 0x6b7   :  { %v1431_v29 = vadd.f32 %v1840_v28, %v1650_v27 }
 0x6b8   :  { %v1425_v30 = vpop.f32.mrf.mxu1 }
 0x6b9   :  { %v1437_v32 = vmul.f32 0.70710677, %v1431_v29  ;;  %v1426_v33 = vadd.f32 %v1650_v27, %v1425_v30  ;;  %v1435_v41 = vmul.f32 0.5, %v1431_v29 }
 0x6bb   :  { %1906 = verf.f32 %v1437_v32  ;;  %v1436_v34 = vmul.f32 0.70710677, %v1426_v33  ;;  %v1434_v38 = vmul.f32 0.5, %v1426_v33 }
 0x6bd   :  { %1908 = verf.f32 %v1436_v34 }
 0x6c8   :  { %v1907_v35 = vpop.eup %1906 }
 0x6c9   :  { %v1441_v37 = vadd.f32 1.0, %v1907_v35 }
 0x6ca   :  { %v1909_v36 = vpop.eup %1908 }
 0x6cb   :  { %v1440_v39 = vadd.f32 1.0, %v1909_v36  ;;  %v1443_v43 = vmul.f32 %v1441_v37, %v1435_v41 }
 0x6cd   :  { %v1442_v42 = vmul.f32 %v1440_v39, %v1434_v38 }
 0x6cf   :  { %1857 = vmatprep.mubr.msk.f32.mxu0 %vm1459_vm2, %v1442_v42 }
 0x6d0   :  { %1858 = vmatmul.mubr.msk.f32.vlgmr.msra.gmra.mxu0 %vm1459_vm2, %v1443_v43 }
 0x790   :  { %v1859_v46 = vpop.f32.mrf.mxu0 }
 0x791   :  { %v1538_v48 = vadd.f32 %v1859_v46, %v1653_v45 }
 0x792   :  { %v1532_v49 = vpop.f32.mrf.mxu0 }
 0x793   :  { %v1533_v50 = vadd.f32 %v1653_v45, %v1532_v49  ;;  %v1542_v51 = vadd.f32 %v1538_v48, %v1341_v19 }
 0x795   :  { %v1548_v52 = vsel %vm144_vm0, %v1542_v51, 0.0  ;;  %v1541_v53 = vadd.f32 %v1533_v50, %v1340_v18 }
 0x796   :  { %1549 = vadd.xlane.f32.xlu1 %v1548_v52 }
 0x797   :  { %v1545_v54 = vsel %vm144_vm0, %v1541_v53, 0.0 }
 0x798   :  { %1546 = vadd.xlane.f32.xlu0 %v1545_v54 }
 0x81f   :  { %v1550_v55 = vpop.xlane.xlu1 %1549 }
 0x820   :  { %v1552_v56 = vmul.f32 0.03125, %v1550_v55 }
 0x821   :  { %v1547_v57 = vpop.xlane.xlu0 %1546 }
 0x822   :  { %v1554_v58 = vsub.f32 %v1542_v51, %v1552_v56  ;;  %v1551_v59 = vmul.f32 0.03125, %v1547_v57 }
 0x824   :  { %v1553_v60 = vsub.f32 %v1541_v53, %v1551_v59  ;;  %v1556_v61 = vmul.f32 %v1554_v58, %v1554_v58 }
 0x826   :  { %v1560_v62 = vsel %vm144_vm0, %v1556_v61, 0.0  ;;  %v1555_v63 = vmul.f32 %v1553_v60, %v1553_v60 }
 0x827   :  { %1561 = vadd.xlane.f32.xlu1 %v1560_v62 }
 0x828   :  { %v1557_v0 = vsel %vm144_vm0, %v1555_v63, 0.0 }
 0x829   :  { %1558 = vadd.xlane.f32.xlu0 %v1557_v0 }
 0x8b0   :  { %v1562_v1 = vpop.xlane.xlu1 %1561 }
 0x8b1   :  { %v1564_v6 = vmul.f32 0.03125, %v1562_v1 }
 0x8b2   :  { %v1559_v3 = vpop.xlane.xlu0 %1558 }
 0x8b3   :  { %v1566_v2 = vadd.f32 1e-12, %v1564_v6  ;;  %v1563_v4 = vmul.f32 0.03125, %v1559_v3 }
 0x8b5   :  { %1910 = vrsqrt.f32 %v1566_v2  ;;  %v1565_v5 = vadd.f32 1e-12, %v1563_v4 }
 0x8b7   :  { %1912 = vrsqrt.f32 %v1565_v5 }
 0x8c2   :  { %v1911_v7 = vpop.eup %1910 }
 0x8c3   :  { %v1570_v9 = vmul.f32 %v1911_v7, %v1554_v58 }
 0x8c4   :  { %v1913_v10 = vpop.eup %1912 }
 0x8c5   :  { %v1569_v12 = vmul.f32 %v1913_v10, %v1553_v60  ;;  %v1578_v13 = vmul.f32 %v1656_v8, %v1570_v9 }
 0x8c7   :  { %v1577_v14 = vmul.f32 %v1656_v8, %v1569_v12  ;;  %v1586_v15 = vadd.f32 %v1657_v11, %v1578_v13 }
 0x8c9   :  { %v1585_v22 = vadd.f32 %v1657_v11, %v1577_v14  ;;  %1588 = vst.msk [vmem:[#allocation11 + $0x8] sm:$0xff] %vm144_vm0, %v1586_v15 }
 0x8cb   :  { %1587 = vst.msk [vmem:[#allocation11] sm:$0xff] %vm144_vm0, %v1585_v22 }
 0x8cc   :  { %2025 = shalt.err (!%p2022_p1)
}
 0x8cd   :  { %1600 = dma.vmem_to_hbm [thread:$0]  %s1595_s20, 256, %s2410_s19, [#allocation4], %s2044_s22, %s2044_s22, %s2045_s2  }
 0x8ce   :  { %2040 = dma.done.wait [#allocation4], 256  }
 0x8cf   :  { %2041 = vsyncadd [#allocation4], 4294967040 }
 0x8d0   :  { %1604 = vsyncpa [#allocation3], 1 }
 0x8d1   :  { %1605 = vsyncpa [#allocation6], 1 }
 0x8d2   :  { %1606 = vsyncpa [#allocation9], 1 }
 0x8d3   :  { %1607 = vsyncpa [#allocation4], 1 }

</bundles_post_ra>
